<compile_context>
chip_gen: v7x
topology: tpu7x:2x2x1
jax: 0.10.0
libtpu: 0.0.40
codegen_flags: <defaults>
</compile_context>

<pallas_src>
import functools

import jax
import jax.numpy as jnp
from jax.experimental import pallas as pl
from jax.experimental.pallas import tpu as pltpu

_EPS = 1e-5
_INV_SQRT2 = 0.7071067811865476

# MXU operand dtype.  bf16 gives ~2x+ MXU throughput and halves patch/weight VMEM on
# v6e/v7x, but these toy contractions are overhead-bound, so f32 (bit-faithful module
# semantics) is the default.  BN/GELU math stays f32 either way (v5e VPU/EUP lack bf16).
_MXU_DTYPE = jnp.float32

# Route the GELU reciprocal through the EUP (frees the binding VALU slot).  approx=True
# drifts the end-to-end result by up to ~1e-2 vs. the exact-erf reference; set False
# to restore <=2e-3 agreement.
_APPROX_RECIP = True


def _gelu(x):
    # Exact (erf-based) GELU, matching torch.nn.GELU() default.  erf via the
    # Abramowitz & Stegun 7.1.26 polynomial (|err| <= 1.5e-7); lax.erf has no Mosaic
    # lowering.  Sign handling folded: gelu(x) = 0.5 * (x + |x| * erf(|x| / sqrt(2))).
    a1, a2, a3, a4, a5 = 0.254829592, -0.284496736, 1.421413741, -1.453152027, 1.061405429
    p = 0.3275911
    ax = jnp.abs(x)
    u = ax * _INV_SQRT2
    t = pl.reciprocal(1.0 + p * u, approx=_APPROX_RECIP)     # EUP, off the VALU slot
    poly = ((((a5 * t + a4) * t + a3) * t + a2) * t + a1) * t
    erf_abs = 1.0 - poly * jnp.exp(-u * u)                   # exp on EUP as well
    return 0.5 * (x + ax * erf_abs)


def _pool_channel_blocks(v, C, E):
    # v: (1, C*E) per-column sums.  Returns per-emb-channel sums pooled over the C
    # spatial-channel blocks, replicated across the blocks (cyclic lane rolls; XLU).
    if C & (C - 1) == 0:                      # log2(C) doubling rolls
        step = E
        while step < C * E:
            v = v + pltpu.roll(v, step, axis=1)
            step *= 2
        return v
    acc = v                                    # fallback: C-1 unit-block rolls
    for c in range(1, C):
        acc = acc + pltpu.roll(v, c * E, axis=1)
    return acc


def _scale_shift(s, q, inv_n):
    # Training-mode BatchNorm (batch stats, biased variance, gamma=1/beta=0) as a
    # per-column (scale, shift).  One-pass E[x^2]-E[x]^2 is fine at these magnitudes.
    # TODO(synk): switch to two-pass stats (and affine / eval-mode running stats) if
    # trained parameters or production-scale T are ever used.
    m = s * inv_n
    scale = jax.lax.rsqrt(q * inv_n - m * m + _EPS)
    return scale, -m * scale


def disjoin_encoder_kernel(p1_ref, w1p_ref, w2p_ref, w3p_ref, smat_ref, out_ref, *,
                           n_valid3):
    N = p1_ref.shape[0]            # B * T1 rows (time-within-batch on sublanes)
    CE = w1p_ref.shape[1]          # C * E lanes
    E = w2p_ref.shape[1]
    C = CE // E

    # ---- Stage 1: temporal Conv2d(1, E, [1, K], 'valid') -----------------------
    # One lane-dense (B*T1, K*C) @ (K*C, C*E) MXU dot for all batches.  Bias dropped:
    # exactly cancelled by the batch-stat mean subtraction below.
    y1 = jnp.dot(p1_ref[...], w1p_ref[...], preferred_element_type=jnp.float32)   # (N, C*E)
    s1 = _pool_channel_blocks(jnp.sum(y1, axis=0, keepdims=True), C, E)
    q1 = _pool_channel_blocks(jnp.sum(y1 * y1, axis=0, keepdims=True), C, E)
    scale1, shift1 = _scale_shift(s1, q1, 1.0 / float(N * C))                      # (1, C*E)
    z1 = _gelu(y1 * scale1 + shift1)                                               # (N, C*E)

    # ---- Stage 2: spatial Conv2d(E, E, [C, 1], 'valid') ------------------------
    # The whole [C, 1] conv collapses to one (B*T1, C*E) @ (C*E, E) dot.
    y2 = jnp.dot(z1.astype(_MXU_DTYPE), w2p_ref[...],
                 preferred_element_type=jnp.float32)                              # (N, E)
    s2 = jnp.sum(y2, axis=0, keepdims=True)
    q2 = jnp.sum(y2 * y2, axis=0, keepdims=True)
    scale2, shift2 = _scale_shift(s2, q2, 1.0 / float(N))
    z2 = _gelu(y2 * scale2 + shift2).astype(_MXU_DTYPE)                           # (N, E)

    # ---- Stage 3: rep Conv1d(E, R, 3, 'valid') ---------------------------------
    # y3[r] = sum_j z2[r + j] @ W3_j with the within-batch shift and the
    # "valid conv position" mask folded into host-built 0/1 matrices smat[j]
    # (tiny MXU dots; avoids sublane-misaligned slice/concat relayouts in-kernel).
    # Invalid rows come out exactly zero, so the stats just use the valid-row count.
    y3 = None
    for j in range(smat_ref.shape[0]):
        zj = jnp.dot(smat_ref[j], z2, preferred_element_type=jnp.float32)         # (N, E)
        term = jnp.dot(zj.astype(_MXU_DTYPE), w3p_ref[j],
                       preferred_element_type=jnp.float32)                        # (N, R_pad)
        y3 = term if y3 is None else y3 + term
    s3 = jnp.sum(y3, axis=0, keepdims=True)
    q3 = jnp.sum(y3 * y3, axis=0, keepdims=True)
    scale3, shift3 = _scale_shift(s3, q3, 1.0 / float(n_valid3))
    # Lane-dense store: R is zero-padded to a multiple of 128 in W3p; the pad lanes
    # (and the 2 per-batch pad rows) are sliced off wrapper-side.
    out_ref[...] = _gelu(y3 * scale3 + shift3)


def _round_up(n, m):
    return ((n + m - 1) // m) * m


def _pack_weights(w1_t, w2_t, w3_t, channel_size, r_pad):
    # Host-side (free) repack of PyTorch-layout conv weights into lane-dense,
    # MXU-ready matrices.  Conv biases are intentionally dropped: training-mode
    # BatchNorm subtracts the per-channel mean over axes on which each bias is
    # constant, so the bias adds cancel exactly in the forward output.
    C = channel_size
    E, _, _, K = w1_t.shape
    R = w3_t.shape[0]
    w1 = w1_t.reshape(E, K).astype(jnp.float32)
    # Block-sparse temporal weight: W1p[k*C + c, c*E + e] = w1[e, k].
    w1p = jnp.einsum('ek,cd->kcde', w1,
                     jnp.eye(C, dtype=jnp.float32)).reshape(K * C, C * E)
    # Spatial weight: W2p[c*E + e, f] = w2[f, e, c, 0].
    w2p = jnp.transpose(w2_t[:, :, :, 0], (2, 1, 0)).reshape(C * E, E).astype(jnp.float32)
    # Rep weight, zero-padded for a lane-dense output store: W3p[j, e, r] = w3[r, e, j].
    w3p = jnp.transpose(w3_t, (2, 1, 0)).astype(jnp.float32)                       # (3, E, R)
    w3p = jnp.pad(w3p, ((0, 0), (0, 0), (0, r_pad - R)))
    return (w1p.astype(_MXU_DTYPE), w2p.astype(_MXU_DTYPE), w3p.astype(_MXU_DTYPE))


def _selection_mats(B, T1, T2):
    # smat[j][r, r + j] = 1 iff row r = b*T1 + t is a valid rep-conv position (t < T2).
    # Folds the within-batch time shift and valid-row masking of stage 3 into 0/1
    # matmuls so the kernel never slices across sublane tiles.
    N = B * T1
    rows = jnp.arange(N)
    cols = jnp.arange(N)
    valid = (rows % T1) < T2
    mats = [((cols[None, :] == (rows + j)[:, None]) & valid[:, None]).astype(jnp.float32)
            for j in range(3)]
    return jnp.stack(mats).astype(_MXU_DTYPE)                                      # (3, N, N)


@jax.jit
def disjoin_encoder(x, w1_t, b1_t, w2_t, b2_t, w3_t, b3_t):
    """Series2Vec DisjoinEncoder forward.  x: (B, channel_size, T) -> (B, rep_size, T2)."""
    del b1_t, b2_t, b3_t    # cancelled exactly by training-mode BatchNorm (see _pack_weights)
    B, C, T = x.shape
    E, _, _, K = w1_t.shape
    R = w3_t.shape[0]
    T1 = T - K + 1
    T2 = T1 - 2
    N = B * T1
    r_pad = _round_up(R, 128)                      # lane-dense output store

    w1p, w2p, w3p = _pack_weights(w1_t, w2_t, w3_t, C, r_pad)
    smat = _selection_mats(B, T1, T2)

    # Stage-1 patch matrix built wrapper-side (pure layout plumbing in XLA), so the
    # kernel starts lane/time-packed and does no in-kernel slice/concat relayouts.
    xT = jnp.transpose(x, (0, 2, 1)).astype(jnp.float32)                           # (B, T, C)
    p1 = jnp.concatenate([xT[:, k:k + T1, :] for k in range(K)], axis=2)           # (B, T1, K*C)
    p1 = p1.reshape(N, K * C).astype(_MXU_DTYPE)

    vmem = pl.BlockSpec(memory_space=pltpu.MemorySpace.VMEM)
    # Grid-less single invocation: every operand is a few KiB so everything stays
    # VMEM/vreg-resident.  TODO(synk): at production B/T add a batch/time grid
    # (halo = K-1+2) with two-pass BN stats so the DMA pipelines and both v7x
    # TensorCores are used, and flip _MXU_DTYPE to bfloat16 on v6e/v7x.
    out = pl.pallas_call(
        functools.partial(disjoin_encoder_kernel, n_valid3=B * T2),
        out_shape=jax.ShapeDtypeStruct((N, r_pad), jnp.float32),
        in_specs=[vmem] * 5,
        out_specs=vmem,
        compiler_params=pltpu.CompilerParams(vmem_limit_bytes=32 * 1024 * 1024),
    )(p1, w1p, w2p, w3p, smat)

    # Un-pad / un-pack back to the module's (B, rep_size, T2) layout (wrapper-side).
    out = out.reshape(B, T1, r_pad)[:, :T2, :R]
    return jnp.transpose(out, (0, 2, 1))


if __name__ == "__main__":
    B, C, T = 2, 4, 16          # batch (>1 so .squeeze() only drops the size-1 spatial dim)
    E, R, K = 32, 32, 4         # emb_size, rep_size, kernel_size  ->  C*E = 128 lanes
    T1, T2 = T - K + 1, T - K - 1

    key = jax.random.PRNGKey(0)
    kx, k1, k2, k3, kb3 = jax.random.split(key, 5)
    x = jax.random.normal(kx, (B, C, T), jnp.float32)

    # Deterministic synthetic parameters in the PyTorch module's shapes.  Conv2d biases
    # are zero (module init); the Conv1d bias is left nonzero to exercise the exact
    # bias-cancellation by training-mode BatchNorm.
    w1_t = jax.random.normal(k1, (E, 1, 1, K), jnp.float32) * (2.0 / (K + E)) ** 0.5
    b1_t = jnp.zeros((E,), jnp.float32)
    w2_t = jax.random.normal(k2, (E, E, C, 1), jnp.float32) * (2.0 / (E * C + E)) ** 0.5
    b2_t = jnp.zeros((E,), jnp.float32)
    w3_t = jax.random.normal(k3, (R, E, 3), jnp.float32) * (2.0 / (E * 3)) ** 0.5
    b3_t = jax.random.normal(kb3, (R,), jnp.float32) * 0.05

    out = jax.block_until_ready(disjoin_encoder(x, w1_t, b1_t, w2_t, b2_t, w3_t, b3_t))
    assert out.shape == (B, R, T2), out.shape

    # Pure-JAX reference of the PyTorch forward (training-mode BN, exact GELU, biases).
    def gelu_ref(v):
        return jax.nn.gelu(v, approximate=False)

    def bn_ref(v, axes):
        m = v.mean(axis=axes, keepdims=True)
        var = v.var(axis=axes, keepdims=True)
        return (v - m) / jnp.sqrt(var + _EPS)

    tp = jnp.stack([x[:, :, j:j + T1] for j in range(K)], axis=-1)        # (B, C, T1, K)
    ref1 = jnp.einsum('bctk,ek->bect', tp, w1_t[:, 0, 0, :]) + b1_t[None, :, None, None]
    ref1 = gelu_ref(bn_ref(ref1, (0, 2, 3)))
    ref2 = jnp.einsum('bect,fec->bft', ref1, w2_t[:, :, :, 0]) + b2_t[None, :, None]
    ref2 = gelu_ref(bn_ref(ref2, (0, 2)))
    rp = jnp.stack([ref2[:, :, j:j + T2] for j in range(3)], axis=-1)     # (B, E, T2, 3)
    ref3 = jnp.einsum('betj,rej->brt', rp, w3_t) + b3_t[None, :, None]
    ref = gelu_ref(bn_ref(ref3, (0, 2)))

    max_err = float(jnp.max(jnp.abs(out - ref)))
    tol = 2e-3
    if _APPROX_RECIP:
        tol = max(tol, 1e-2)          # EUP approx-reciprocal drift in the erf polynomial
    if _MXU_DTYPE is jnp.bfloat16:
        tol = max(tol, 5e-2)          # bf16 MXU operand drift
    assert jnp.allclose(out, ref, atol=tol, rtol=tol), max_err
    print("KERNEL_OK")
</pallas_src>

<mosaic_0001>
module attributes {stable_mosaic.version = 11 : i64} {
  func.func @disjoin_encoder_kernel(%arg0: memref<26x16xf32, #tpu.memory_space<vmem>>, %arg1: memref<16x128xf32, #tpu.memory_space<vmem>>, %arg2: memref<128x32xf32, #tpu.memory_space<vmem>>, %arg3: memref<3x32x128xf32, #tpu.memory_space<vmem>>, %arg4: memref<3x26x26xf32, #tpu.memory_space<vmem>>, %arg5: memref<26x128xf32, #tpu.memory_space<vmem>>) attributes {dimension_semantics = [], scalar_prefetch = 0 : i64, scratch_operands = 0 : i64, tpu.core_type = #tpu.core_type<tc>} {
    %c0 = arith.constant 0 : index
    %c0_0 = arith.constant 0 : index
    %0 = vector.load %arg0[%c0, %c0_0] : memref<26x16xf32, #tpu.memory_space<vmem>>, vector<26x16xf32>
    %c0_1 = arith.constant 0 : index
    %c0_2 = arith.constant 0 : index
    %1 = vector.load %arg1[%c0_1, %c0_2] : memref<16x128xf32, #tpu.memory_space<vmem>>, vector<16x128xf32>
    %cst = arith.constant dense<0.000000e+00> : vector<26x128xf32>
    %2 = tpu.matmul %0, %1, %cst {dimension_numbers = #tpu.dot_dimension_numbers<[1], [0], [0], [1], [0, 0, 1, 1], [], []>} : vector<26x16xf32>, vector<16x128xf32>, vector<26x128xf32> -> vector<26x128xf32>
    %cst_3 = arith.constant dense<0.000000e+00> : vector<128xf32>
    %3 = vector.multi_reduction <add>, %2, %cst_3 [0] : vector<26x128xf32> to vector<128xf32>
    %4 = vector.shape_cast %3 : vector<128xf32> to vector<1x128xf32>
    %c32_i32 = arith.constant 32 : i32
    %5 = tpu.dynamic_rotate %4 by %c32_i32 dim 1 : vector<1x128xf32>, i32 -> vector<1x128xf32>
    %6 = arith.addf %4, %5 : vector<1x128xf32>
    %c64_i32 = arith.constant 64 : i32
    %7 = tpu.dynamic_rotate %6 by %c64_i32 dim 1 : vector<1x128xf32>, i32 -> vector<1x128xf32>
    %8 = arith.addf %6, %7 : vector<1x128xf32>
    %9 = arith.mulf %2, %2 : vector<26x128xf32>
    %cst_4 = arith.constant dense<0.000000e+00> : vector<128xf32>
    %10 = vector.multi_reduction <add>, %9, %cst_4 [0] : vector<26x128xf32> to vector<128xf32>
    %11 = vector.shape_cast %10 : vector<128xf32> to vector<1x128xf32>
    %c32_i32_5 = arith.constant 32 : i32
    %12 = tpu.dynamic_rotate %11 by %c32_i32_5 dim 1 : vector<1x128xf32>, i32 -> vector<1x128xf32>
    %13 = arith.addf %11, %12 : vector<1x128xf32>
    %c64_i32_6 = arith.constant 64 : i32
    %14 = tpu.dynamic_rotate %13 by %c64_i32_6 dim 1 : vector<1x128xf32>, i32 -> vector<1x128xf32>
    %15 = arith.addf %13, %14 : vector<1x128xf32>
    %cst_7 = arith.constant 0.00961538497 : f32
    %16 = vector.broadcast %cst_7 : f32 to vector<1x128xf32>
    %17 = arith.mulf %8, %16 : vector<1x128xf32>
    %cst_8 = arith.constant 0.00961538497 : f32
    %18 = vector.broadcast %cst_8 : f32 to vector<1x128xf32>
    %19 = arith.mulf %15, %18 : vector<1x128xf32>
    %20 = arith.mulf %17, %17 : vector<1x128xf32>
    %21 = arith.subf %19, %20 : vector<1x128xf32>
    %cst_9 = arith.constant 9.99999974E-6 : f32
    %22 = vector.broadcast %cst_9 : f32 to vector<1x128xf32>
    %23 = arith.addf %21, %22 : vector<1x128xf32>
    %24 = math.rsqrt %23 : vector<1x128xf32>
    %cst_10 = arith.constant 0.000000e+00 : f32
    %25 = vector.broadcast %cst_10 : f32 to vector<1x128xf32>
    %26 = arith.subf %25, %17 : vector<1x128xf32>
    %27 = arith.mulf %26, %24 : vector<1x128xf32>
    %28 = vector.broadcast %24 : vector<1x128xf32> to vector<26x128xf32>
    %29 = arith.mulf %2, %28 : vector<26x128xf32>
    %30 = vector.broadcast %27 : vector<1x128xf32> to vector<26x128xf32>
    %31 = arith.addf %29, %30 : vector<26x128xf32>
    %32 = math.absf %31 : vector<26x128xf32>
    %cst_11 = arith.constant 0.707106769 : f32
    %33 = vector.broadcast %cst_11 : f32 to vector<26x128xf32>
    %34 = arith.mulf %32, %33 : vector<26x128xf32>
    %cst_12 = arith.constant 0.327591091 : f32
    %35 = vector.broadcast %cst_12 : f32 to vector<26x128xf32>
    %36 = arith.mulf %35, %34 : vector<26x128xf32>
    %cst_13 = arith.constant 1.000000e+00 : f32
    %37 = vector.broadcast %cst_13 : f32 to vector<26x128xf32>
    %38 = arith.addf %37, %36 : vector<26x128xf32>
    %39 = tpu.reciprocal %38 {approx = true} : vector<26x128xf32> -> vector<26x128xf32>
    %cst_14 = arith.constant 1.06140542 : f32
    %40 = vector.broadcast %cst_14 : f32 to vector<26x128xf32>
    %41 = arith.mulf %40, %39 : vector<26x128xf32>
    %cst_15 = arith.constant -1.45315206 : f32
    %42 = vector.broadcast %cst_15 : f32 to vector<26x128xf32>
    %43 = arith.addf %41, %42 : vector<26x128xf32>
    %44 = arith.mulf %43, %39 : vector<26x128xf32>
    %cst_16 = arith.constant 1.42141378 : f32
    %45 = vector.broadcast %cst_16 : f32 to vector<26x128xf32>
    %46 = arith.addf %44, %45 : vector<26x128xf32>
    %47 = arith.mulf %46, %39 : vector<26x128xf32>
    %cst_17 = arith.constant -0.284496725 : f32
    %48 = vector.broadcast %cst_17 : f32 to vector<26x128xf32>
    %49 = arith.addf %47, %48 : vector<26x128xf32>
    %50 = arith.mulf %49, %39 : vector<26x128xf32>
    %cst_18 = arith.constant 0.254829586 : f32
    %51 = vector.broadcast %cst_18 : f32 to vector<26x128xf32>
    %52 = arith.addf %50, %51 : vector<26x128xf32>
    %53 = arith.mulf %52, %39 : vector<26x128xf32>
    %cst_19 = arith.constant 0.000000e+00 : f32
    %54 = vector.broadcast %cst_19 : f32 to vector<26x128xf32>
    %55 = arith.subf %54, %34 : vector<26x128xf32>
    %56 = arith.mulf %55, %34 : vector<26x128xf32>
    %57 = math.exp %56 : vector<26x128xf32>
    %58 = arith.mulf %53, %57 : vector<26x128xf32>
    %cst_20 = arith.constant 1.000000e+00 : f32
    %59 = vector.broadcast %cst_20 : f32 to vector<26x128xf32>
    %60 = arith.subf %59, %58 : vector<26x128xf32>
    %61 = arith.mulf %32, %60 : vector<26x128xf32>
    %62 = arith.addf %31, %61 : vector<26x128xf32>
    %cst_21 = arith.constant 5.000000e-01 : f32
    %63 = vector.broadcast %cst_21 : f32 to vector<26x128xf32>
    %64 = arith.mulf %63, %62 : vector<26x128xf32>
    %c0_22 = arith.constant 0 : index
    %c0_23 = arith.constant 0 : index
    %65 = vector.load %arg2[%c0_22, %c0_23] : memref<128x32xf32, #tpu.memory_space<vmem>>, vector<128x32xf32>
    %cst_24 = arith.constant dense<0.000000e+00> : vector<26x32xf32>
    %66 = tpu.matmul %64, %65, %cst_24 {dimension_numbers = #tpu.dot_dimension_numbers<[1], [0], [0], [1], [0, 0, 1, 1], [], []>} : vector<26x128xf32>, vector<128x32xf32>, vector<26x32xf32> -> vector<26x32xf32>
    %cst_25 = arith.constant dense<0.000000e+00> : vector<32xf32>
    %67 = vector.multi_reduction <add>, %66, %cst_25 [0] : vector<26x32xf32> to vector<32xf32>
    %68 = vector.shape_cast %67 : vector<32xf32> to vector<1x32xf32>
    %69 = arith.mulf %66, %66 : vector<26x32xf32>
    %cst_26 = arith.constant dense<0.000000e+00> : vector<32xf32>
    %70 = vector.multi_reduction <add>, %69, %cst_26 [0] : vector<26x32xf32> to vector<32xf32>
    %71 = vector.shape_cast %70 : vector<32xf32> to vector<1x32xf32>
    %cst_27 = arith.constant 0.0384615399 : f32
    %72 = vector.broadcast %cst_27 : f32 to vector<1x32xf32>
    %73 = arith.mulf %68, %72 : vector<1x32xf32>
    %cst_28 = arith.constant 0.0384615399 : f32
    %74 = vector.broadcast %cst_28 : f32 to vector<1x32xf32>
    %75 = arith.mulf %71, %74 : vector<1x32xf32>
    %76 = arith.mulf %73, %73 : vector<1x32xf32>
    %77 = arith.subf %75, %76 : vector<1x32xf32>
    %cst_29 = arith.constant 9.99999974E-6 : f32
    %78 = vector.broadcast %cst_29 : f32 to vector<1x32xf32>
    %79 = arith.addf %77, %78 : vector<1x32xf32>
    %80 = math.rsqrt %79 : vector<1x32xf32>
    %cst_30 = arith.constant 0.000000e+00 : f32
    %81 = vector.broadcast %cst_30 : f32 to vector<1x32xf32>
    %82 = arith.subf %81, %73 : vector<1x32xf32>
    %83 = arith.mulf %82, %80 : vector<1x32xf32>
    %84 = vector.broadcast %80 : vector<1x32xf32> to vector<26x32xf32>
    %85 = arith.mulf %66, %84 : vector<26x32xf32>
    %86 = vector.broadcast %83 : vector<1x32xf32> to vector<26x32xf32>
    %87 = arith.addf %85, %86 : vector<26x32xf32>
    %88 = math.absf %87 : vector<26x32xf32>
    %cst_31 = arith.constant 0.707106769 : f32
    %89 = vector.broadcast %cst_31 : f32 to vector<26x32xf32>
    %90 = arith.mulf %88, %89 : vector<26x32xf32>
    %cst_32 = arith.constant 0.327591091 : f32
    %91 = vector.broadcast %cst_32 : f32 to vector<26x32xf32>
    %92 = arith.mulf %91, %90 : vector<26x32xf32>
    %cst_33 = arith.constant 1.000000e+00 : f32
    %93 = vector.broadcast %cst_33 : f32 to vector<26x32xf32>
    %94 = arith.addf %93, %92 : vector<26x32xf32>
    %95 = tpu.reciprocal %94 {approx = true} : vector<26x32xf32> -> vector<26x32xf32>
    %cst_34 = arith.constant 1.06140542 : f32
    %96 = vector.broadcast %cst_34 : f32 to vector<26x32xf32>
    %97 = arith.mulf %96, %95 : vector<26x32xf32>
    %cst_35 = arith.constant -1.45315206 : f32
    %98 = vector.broadcast %cst_35 : f32 to vector<26x32xf32>
    %99 = arith.addf %97, %98 : vector<26x32xf32>
    %100 = arith.mulf %99, %95 : vector<26x32xf32>
    %cst_36 = arith.constant 1.42141378 : f32
    %101 = vector.broadcast %cst_36 : f32 to vector<26x32xf32>
    %102 = arith.addf %100, %101 : vector<26x32xf32>
    %103 = arith.mulf %102, %95 : vector<26x32xf32>
    %cst_37 = arith.constant -0.284496725 : f32
    %104 = vector.broadcast %cst_37 : f32 to vector<26x32xf32>
    %105 = arith.addf %103, %104 : vector<26x32xf32>
    %106 = arith.mulf %105, %95 : vector<26x32xf32>
    %cst_38 = arith.constant 0.254829586 : f32
    %107 = vector.broadcast %cst_38 : f32 to vector<26x32xf32>
    %108 = arith.addf %106, %107 : vector<26x32xf32>
    %109 = arith.mulf %108, %95 : vector<26x32xf32>
    %cst_39 = arith.constant 0.000000e+00 : f32
    %110 = vector.broadcast %cst_39 : f32 to vector<26x32xf32>
    %111 = arith.subf %110, %90 : vector<26x32xf32>
    %112 = arith.mulf %111, %90 : vector<26x32xf32>
    %113 = math.exp %112 : vector<26x32xf32>
    %114 = arith.mulf %109, %113 : vector<26x32xf32>
    %cst_40 = arith.constant 1.000000e+00 : f32
    %115 = vector.broadcast %cst_40 : f32 to vector<26x32xf32>
    %116 = arith.subf %115, %114 : vector<26x32xf32>
    %117 = arith.mulf %88, %116 : vector<26x32xf32>
    %118 = arith.addf %87, %117 : vector<26x32xf32>
    %cst_41 = arith.constant 5.000000e-01 : f32
    %119 = vector.broadcast %cst_41 : f32 to vector<26x32xf32>
    %120 = arith.mulf %119, %118 : vector<26x32xf32>
    %c0_42 = arith.constant 0 : index
    %c0_43 = arith.constant 0 : index
    %c0_44 = arith.constant 0 : index
    %121 = vector.load %arg4[%c0_42, %c0_43, %c0_44] : memref<3x26x26xf32, #tpu.memory_space<vmem>>, vector<1x26x26xf32>
    %122 = vector.shape_cast %121 : vector<1x26x26xf32> to vector<26x26xf32>
    %cst_45 = arith.constant dense<0.000000e+00> : vector<26x32xf32>
    %123 = tpu.matmul %122, %120, %cst_45 {dimension_numbers = #tpu.dot_dimension_numbers<[1], [0], [0], [1], [0, 0, 1, 1], [], []>} : vector<26x26xf32>, vector<26x32xf32>, vector<26x32xf32> -> vector<26x32xf32>
    %c0_46 = arith.constant 0 : index
    %c0_47 = arith.constant 0 : index
    %c0_48 = arith.constant 0 : index
    %124 = vector.load %arg3[%c0_46, %c0_47, %c0_48] : memref<3x32x128xf32, #tpu.memory_space<vmem>>, vector<1x32x128xf32>
    %125 = vector.shape_cast %124 : vector<1x32x128xf32> to vector<32x128xf32>
    %cst_49 = arith.constant dense<0.000000e+00> : vector<26x128xf32>
    %126 = tpu.matmul %123, %125, %cst_49 {dimension_numbers = #tpu.dot_dimension_numbers<[1], [0], [0], [1], [0, 0, 1, 1], [], []>} : vector<26x32xf32>, vector<32x128xf32>, vector<26x128xf32> -> vector<26x128xf32>
    %c1 = arith.constant 1 : index
    %c0_50 = arith.constant 0 : index
    %c0_51 = arith.constant 0 : index
    %127 = vector.load %arg4[%c1, %c0_50, %c0_51] : memref<3x26x26xf32, #tpu.memory_space<vmem>>, vector<1x26x26xf32>
    %128 = vector.shape_cast %127 : vector<1x26x26xf32> to vector<26x26xf32>
    %cst_52 = arith.constant dense<0.000000e+00> : vector<26x32xf32>
    %129 = tpu.matmul %128, %120, %cst_52 {dimension_numbers = #tpu.dot_dimension_numbers<[1], [0], [0], [1], [0, 0, 1, 1], [], []>} : vector<26x26xf32>, vector<26x32xf32>, vector<26x32xf32> -> vector<26x32xf32>
    %c1_53 = arith.constant 1 : index
    %c0_54 = arith.constant 0 : index
    %c0_55 = arith.constant 0 : index
    %130 = vector.load %arg3[%c1_53, %c0_54, %c0_55] : memref<3x32x128xf32, #tpu.memory_space<vmem>>, vector<1x32x128xf32>
    %131 = vector.shape_cast %130 : vector<1x32x128xf32> to vector<32x128xf32>
    %cst_56 = arith.constant dense<0.000000e+00> : vector<26x128xf32>
    %132 = tpu.matmul %129, %131, %cst_56 {dimension_numbers = #tpu.dot_dimension_numbers<[1], [0], [0], [1], [0, 0, 1, 1], [], []>} : vector<26x32xf32>, vector<32x128xf32>, vector<26x128xf32> -> vector<26x128xf32>
    %133 = arith.addf %126, %132 : vector<26x128xf32>
    %c2 = arith.constant 2 : index
    %c0_57 = arith.constant 0 : index
    %c0_58 = arith.constant 0 : index
    %134 = vector.load %arg4[%c2, %c0_57, %c0_58] : memref<3x26x26xf32, #tpu.memory_space<vmem>>, vector<1x26x26xf32>
    %135 = vector.shape_cast %134 : vector<1x26x26xf32> to vector<26x26xf32>
    %cst_59 = arith.constant dense<0.000000e+00> : vector<26x32xf32>
    %136 = tpu.matmul %135, %120, %cst_59 {dimension_numbers = #tpu.dot_dimension_numbers<[1], [0], [0], [1], [0, 0, 1, 1], [], []>} : vector<26x26xf32>, vector<26x32xf32>, vector<26x32xf32> -> vector<26x32xf32>
    %c2_60 = arith.constant 2 : index
    %c0_61 = arith.constant 0 : index
    %c0_62 = arith.constant 0 : index
    %137 = vector.load %arg3[%c2_60, %c0_61, %c0_62] : memref<3x32x128xf32, #tpu.memory_space<vmem>>, vector<1x32x128xf32>
    %138 = vector.shape_cast %137 : vector<1x32x128xf32> to vector<32x128xf32>
    %cst_63 = arith.constant dense<0.000000e+00> : vector<26x128xf32>
    %139 = tpu.matmul %136, %138, %cst_63 {dimension_numbers = #tpu.dot_dimension_numbers<[1], [0], [0], [1], [0, 0, 1, 1], [], []>} : vector<26x32xf32>, vector<32x128xf32>, vector<26x128xf32> -> vector<26x128xf32>
    %140 = arith.addf %133, %139 : vector<26x128xf32>
    %cst_64 = arith.constant dense<0.000000e+00> : vector<128xf32>
    %141 = vector.multi_reduction <add>, %140, %cst_64 [0] : vector<26x128xf32> to vector<128xf32>
    %142 = vector.shape_cast %141 : vector<128xf32> to vector<1x128xf32>
    %143 = arith.mulf %140, %140 : vector<26x128xf32>
    %cst_65 = arith.constant dense<0.000000e+00> : vector<128xf32>
    %144 = vector.multi_reduction <add>, %143, %cst_65 [0] : vector<26x128xf32> to vector<128xf32>
    %145 = vector.shape_cast %144 : vector<128xf32> to vector<1x128xf32>
    %cst_66 = arith.constant 0.0454545468 : f32
    %146 = vector.broadcast %cst_66 : f32 to vector<1x128xf32>
    %147 = arith.mulf %142, %146 : vector<1x128xf32>
    %cst_67 = arith.constant 0.0454545468 : f32
    %148 = vector.broadcast %cst_67 : f32 to vector<1x128xf32>
    %149 = arith.mulf %145, %148 : vector<1x128xf32>
    %150 = arith.mulf %147, %147 : vector<1x128xf32>
    %151 = arith.subf %149, %150 : vector<1x128xf32>
    %cst_68 = arith.constant 9.99999974E-6 : f32
    %152 = vector.broadcast %cst_68 : f32 to vector<1x128xf32>
    %153 = arith.addf %151, %152 : vector<1x128xf32>
    %154 = math.rsqrt %153 : vector<1x128xf32>
    %cst_69 = arith.constant 0.000000e+00 : f32
    %155 = vector.broadcast %cst_69 : f32 to vector<1x128xf32>
    %156 = arith.subf %155, %147 : vector<1x128xf32>
    %157 = arith.mulf %156, %154 : vector<1x128xf32>
    %158 = vector.broadcast %154 : vector<1x128xf32> to vector<26x128xf32>
    %159 = arith.mulf %140, %158 : vector<26x128xf32>
    %160 = vector.broadcast %157 : vector<1x128xf32> to vector<26x128xf32>
    %161 = arith.addf %159, %160 : vector<26x128xf32>
    %162 = math.absf %161 : vector<26x128xf32>
    %cst_70 = arith.constant 0.707106769 : f32
    %163 = vector.broadcast %cst_70 : f32 to vector<26x128xf32>
    %164 = arith.mulf %162, %163 : vector<26x128xf32>
    %cst_71 = arith.constant 0.327591091 : f32
    %165 = vector.broadcast %cst_71 : f32 to vector<26x128xf32>
    %166 = arith.mulf %165, %164 : vector<26x128xf32>
    %cst_72 = arith.constant 1.000000e+00 : f32
    %167 = vector.broadcast %cst_72 : f32 to vector<26x128xf32>
    %168 = arith.addf %167, %166 : vector<26x128xf32>
    %169 = tpu.reciprocal %168 {approx = true} : vector<26x128xf32> -> vector<26x128xf32>
    %cst_73 = arith.constant 1.06140542 : f32
    %170 = vector.broadcast %cst_73 : f32 to vector<26x128xf32>
    %171 = arith.mulf %170, %169 : vector<26x128xf32>
    %cst_74 = arith.constant -1.45315206 : f32
    %172 = vector.broadcast %cst_74 : f32 to vector<26x128xf32>
    %173 = arith.addf %171, %172 : vector<26x128xf32>
    %174 = arith.mulf %173, %169 : vector<26x128xf32>
    %cst_75 = arith.constant 1.42141378 : f32
    %175 = vector.broadcast %cst_75 : f32 to vector<26x128xf32>
    %176 = arith.addf %174, %175 : vector<26x128xf32>
    %177 = arith.mulf %176, %169 : vector<26x128xf32>
    %cst_76 = arith.constant -0.284496725 : f32
    %178 = vector.broadcast %cst_76 : f32 to vector<26x128xf32>
    %179 = arith.addf %177, %178 : vector<26x128xf32>
    %180 = arith.mulf %179, %169 : vector<26x128xf32>
    %cst_77 = arith.constant 0.254829586 : f32
    %181 = vector.broadcast %cst_77 : f32 to vector<26x128xf32>
    %182 = arith.addf %180, %181 : vector<26x128xf32>
    %183 = arith.mulf %182, %169 : vector<26x128xf32>
    %cst_78 = arith.constant 0.000000e+00 : f32
    %184 = vector.broadcast %cst_78 : f32 to vector<26x128xf32>
    %185 = arith.subf %184, %164 : vector<26x128xf32>
    %186 = arith.mulf %185, %164 : vector<26x128xf32>
    %187 = math.exp %186 : vector<26x128xf32>
    %188 = arith.mulf %183, %187 : vector<26x128xf32>
    %cst_79 = arith.constant 1.000000e+00 : f32
    %189 = vector.broadcast %cst_79 : f32 to vector<26x128xf32>
    %190 = arith.subf %189, %188 : vector<26x128xf32>
    %191 = arith.mulf %162, %190 : vector<26x128xf32>
    %192 = arith.addf %161, %191 : vector<26x128xf32>
    %cst_80 = arith.constant 5.000000e-01 : f32
    %193 = vector.broadcast %cst_80 : f32 to vector<26x128xf32>
    %194 = arith.mulf %193, %192 : vector<26x128xf32>
    %c0_81 = arith.constant 0 : index
    %c0_82 = arith.constant 0 : index
    %195 = vector.load %arg5[%c0_81, %c0_82] : memref<26x128xf32, #tpu.memory_space<vmem>>, vector<26x128xf32>
    tpu.vector_store %arg5[%c0_81, %c0_82], %194 {strides = array<i32>} : memref<26x128xf32, #tpu.memory_space<vmem>>, vector<26x128xf32>,
    return
  }
}

</mosaic_0001>

<bundles_post_ra>
// kernel: disjoin_encoder.1
= control target key start
LH: loop header
LB: loop body
LE: loop exit
PB: predicated region body
PF: predicated region fallthrough
CT: control target
= control target key end

     0   :  { %vm26_vm0 = vcmask 130048   ;;  %vm126_vm1 = vcmask 1041408   ;;  %s1685_s29 = smov 64   ;;  %vm522_vm2 = vcmask 211968   ;;  %vm378_vm3 = vcmask 261120   ;;  %s2038_s1 = inlined_call_operand.vmem [shape: f32[16,128], index: 1, kind: input, shape index: {}]   ;;  %s2039_s0 = inlined_call_operand.vmem [shape: f32[26,16], index: 0, kind: input, shape index: {}]   ;;  %s2040_s2 = inlined_call_operand.vmem [shape: f32[128,32], index: 2, kind: input, shape index: {}]   ;;  %s2041_s4 = inlined_call_operand.vmem [shape: f32[3,26,26], index: 4, kind: input, shape index: {}]   ;;  %s2042_s3 = inlined_call_operand.vmem [shape: f32[3,32,128], index: 3, kind: input, shape index: {}]   ;;  %s2043_s5 = inlined_call_operand.vmem [shape: f32[26,128], index: 5, kind: output, shape index: {}]  }
   0x1   :  { %v24_v0 = vld [vmem:[%s2038_s1] sm:$0xff]  ;;  %v25_v1 = vld [vmem:[%s2038_s1 + $0x8] sm:$0xff]  ;;  %v22_v5 = vld [vmem:[%s2039_s0 + $0x10] sm:$0xff]  ;;  %vm384_vm4 = vcmask 254976   ;;  %vm1686_vm5 = vmmov 1  }
   0x2   :  { %v20_v2 = vld [vmem:[%s2039_s0] sm:$0xff]  ;;  %v1529_v3 = vpack.c.bf16 %v25_v1, %v24_v0  ;;  %v21_v4 = vld [vmem:[%s2039_s0 + $0x8] sm:$0xff]  ;;  %v23_v6 = vld [vmem:[%s2039_s0 + $0x18] sm:$0x3]  ;;  %s1684_s0 = smov 32  }
   0x3   :  { %1401 = vmatprep.mubr.msk.f32.mxu0 %vm26_vm0, %v20_v2  ;;  %v277_v37 = vld [vmem:[%s2040_s2] sm:$0xff]  ;;  %v278_v38 = vld [vmem:[%s2040_s2 + $0x8] sm:$0xff]  ;;  %v279_v39 = vld [vmem:[%s2040_s2 + $0x10] sm:$0xff] }
   0x4   :  { %1530 = vmatprep.subr.bf16.mxu0 %v1529_v3  ;;  %v1533_v41 = vpack.c.bf16 %v278_v38, %v277_v37  ;;  %v280_v42 = vld [vmem:[%s2040_s2 + $0x18] sm:$0xff]  ;;  %v281_v45 = vld [vmem:[%s2040_s2 + $0x20] sm:$0xff]  ;;  %v282_v46 = vld [vmem:[%s2040_s2 + $0x28] sm:$0xff] }
   0x5   :  { %1532 = vmatpush3.bf16.msra.mxu0 %v1529_v3  ;;  %v1537_v44 = vpack.c.bf16 %v280_v42, %v279_v39  ;;  %v1541_v47 = vpack.c.bf16 %v282_v46, %v281_v45  ;;  %v283_v48 = vld [vmem:[%s2040_s2 + $0x30] sm:$0xff]  ;;  %v284_v49 = vld [vmem:[%s2040_s2 + $0x38] sm:$0xff]  ;;  %v285_v51 = vld [vmem:[%s2040_s2 + $0x40] sm:$0xff] }
   0x6   :  { %1534 = vmatprep.subr.bf16.mxu1 %v1533_v41  ;;  %v1545_v50 = vpack.c.bf16 %v284_v49, %v283_v48  ;;  %v286_v52 = vld [vmem:[%s2040_s2 + $0x48] sm:$0xff]  ;;  %v287_v54 = vld [vmem:[%s2040_s2 + $0x50] sm:$0xff]  ;;  %v288_v55 = vld [vmem:[%s2040_s2 + $0x58] sm:$0xff] }
   0x7   :  { %1536 = vmatpush3.bf16.msra.mxu1 %v1533_v41  ;;  %v1549_v53 = vpack.c.bf16 %v286_v52, %v285_v51  ;;  %v1553_v56 = vpack.c.bf16 %v288_v55, %v287_v54  ;;  %v289_v57 = vld [vmem:[%s2040_s2 + $0x60] sm:$0xff]  ;;  %v290_v58 = vld [vmem:[%s2040_s2 + $0x68] sm:$0xff]  ;;  %v291_v60 = vld [vmem:[%s2040_s2 + $0x70] sm:$0xff] }
   0x8   :  { %1402 = vmatmul.mubr.msk.f32.vlgmr.msra.gmra.mrb[0].mxu0 %vm26_vm0, %v21_v4  ;;  %1538 = vmatprep.subr.bf16.mxu1 %v1537_v44  ;;  %v1557_v59 = vpack.c.bf16 %v290_v58, %v289_v57  ;;  %v292_v61 = vld [vmem:[%s2040_s2 + $0x78] sm:$0xff]  ;;  %vm1888_vm6 = vmpackc.low %vm126_vm1, %vm1686_vm5 }
   0x9   :  { %1404 = vmatprep.mubr.msk.f32.mxu0 %vm26_vm0, %v22_v5  ;;  %v1561_v62 = vpack.c.bf16 %v292_v61, %v291_v60 }
   0xb   :  { %1540 = vmatpush3.bf16.msra.mxu1 %v1537_v44 }
   0xc   :  { %1405 = vmatmul.mubr.msk.f32.gmra.mrb[2].mxu0 %vm26_vm0, %v23_v6  ;;  %1542 = vmatprep.subr.bf16.mxu1 %v1541_v47 }
   0xf   :  { %1544 = vmatpush3.bf16.msra.mxu1 %v1541_v47 }
  0x10   :  { %1546 = vmatprep.subr.bf16.mxu1 %v1545_v50 }
  0x13   :  { %1548 = vmatpush3.bf16.msra.mxu1 %v1545_v50 }
  0x14   :  { %1550 = vmatprep.subr.bf16.mxu1 %v1549_v53 }
  0x17   :  { %1552 = vmatpush3.bf16.msra.mxu1 %v1549_v53 }
  0x18   :  { %1554 = vmatprep.subr.bf16.mxu1 %v1553_v56 }
  0x1b   :  { %1556 = vmatpush3.bf16.msra.mxu1 %v1553_v56 }
  0x1c   :  { %1558 = vmatprep.subr.bf16.mxu1 %v1557_v59 }
  0x1f   :  { %1560 = vmatpush3.bf16.msra.mxu1 %v1557_v59 }
  0x20   :  { %1562 = vmatprep.subr.bf16.mxu1 %v1561_v62 }
  0x23   :  { %1564 = vmatpush3.bf16.msra.mxu1 %v1561_v62 }
  0xdb   :  { %v1735_v7 = vpop.f32.mrb[0].mxu0 }
  0xdc   :  { %v142_v8 = vmul.f32 %v1735_v7, %v1735_v7  ;;  %v1739_v9 = vpop.f32.mrb[1].mxu0 }
  0xdd   :  { %v124_v10 = vadd.f32 %v1735_v7, %v1739_v9  ;;  %v141_v11 = vmul.f32 %v1739_v9, %v1739_v9 }
  0xdf   :  { %v145_v12 = vadd.f32 %v142_v8, %v141_v11  ;;  %v1745_v13 = vpop.f32.mrb[2].mxu0 }
  0xe0   :  { %v144_v14 = vmul.f32 %v1745_v13, %v1745_v13  ;;  %v1749_v15 = vpop.f32.mrb[3].mxu0  ;;  %v127_v18 = vsel %vm126_vm1, %v1745_v13, 0.0 }
  0xe1   :  { %v125_v16 = vadd.f32 %v124_v10, %v1749_v15  ;;  %v143_v17 = vmul.f32 %v1749_v15, %v1749_v15  ;;  %v169_v10 = vlaneseq }
  0xe2   :  { %v147_v21 = vsel %vm126_vm1, %v144_v14, 0.0 }
  0xe3   :  { %v128_v19 = vadd.f32 %v127_v18, %v125_v16  ;;  %v146_v20 = vadd.f32 %v145_v12, %v143_v17  ;;  %v170_v11 = vshrl.u32 %v169_v10, 7 }
  0xe5   :  { %v148_v22 = vadd.f32 %v147_v21, %v146_v20  ;;  %v129_v23 = vrot.slane %v128_v19, 4  ;;  %v171_v12 = vsub.s32 0, %v170_v11 }
  0xe7   :  { %v149_v24 = vrot.slane %v148_v22, 4  ;;  %v130_v25 = vadd.f32 %v129_v23, %v128_v19 }
  0xe9   :  { %v131_v26 = vrot.slane %v130_v25, 2  ;;  %v150_v27 = vadd.f32 %v149_v24, %v148_v22 }
  0xeb   :  { %v132_v28 = vadd.f32 %v131_v26, %v130_v25  ;;  %v151_v29 = vrot.slane %v150_v27, 2 }
  0xed   :  { %v133_v30 = vrot.slane %v132_v28, 1  ;;  %v152_v31 = vadd.f32 %v151_v29, %v150_v27 }
  0xef   :  { %v134_v32 = vadd.f32 %v133_v30, %v132_v28  ;;  %v153_v33 = vrot.slane %v152_v31, 1 }
  0xf1   :  { %135 = vrot.lane.b32.xlu0 %v134_v32, %s1684_s0  ;;  %v154_v34 = vadd.f32 %v153_v33, %v152_v31 }
  0xf5   :  { %155 = vrot.lane.b32.xlu0 %v154_v34, %s1684_s0 }
 0x163   :  { %v136_v35 = vpop.permute.xlu0 %135 }
 0x164   :  { %v137_v36 = vadd.f32 %v136_v35, %v134_v32 }
 0x166   :  { %138 = vrot.lane.b32.xlu1 %v137_v36, %s1685_s29 }
 0x167   :  { %v156_v40 = vpop.permute.xlu0 %155 }
 0x168   :  { %v157_v43 = vadd.f32 %v156_v40, %v154_v34 }
 0x16a   :  { %158 = vrot.lane.b32.xlu1 %v157_v43, %s1685_s29 }
 0x1d8   :  { %v139_v63 = vpop.permute.xlu1 %138 }
 0x1d9   :  { %v140_v0 = vadd.f32 %v139_v63, %v137_v36 }
 0x1db   :  { %v161_v1 = vmul.f32 0.009615385, %v140_v0 }
 0x1dc   :  { %v159_v2 = vpop.permute.xlu1 %158 }
 0x1dd   :  { %v160_v3 = vadd.f32 %v159_v2, %v157_v43  ;;  %v163_v4 = vmul.f32 %v161_v1, %v161_v1  ;;  %v167_v14 = vsub.f32 0.0, %v161_v1 }
 0x1df   :  { %v162_v5 = vmul.f32 0.009615385, %v160_v3 }
 0x1e1   :  { %v164_v6 = vsub.f32 %v162_v5, %v163_v4 }
 0x1e3   :  { %v165_v8 = vadd.f32 1e-05, %v164_v6 }
 0x1e5   :  { %1630 = vrsqrt.f32 %v165_v8 }
 0x1ef   :  { %v1631_v16 = vpop.eup %1630 }
 0x1f0   :  { %v168_v17 = vmul.f32 %v1631_v16, %v167_v14  ;;  %v172_v18 = vrot.slane %v1631_v16, %v171_v12 }
 0x1f2   :  { %v173_v19 = vmul.f32 %v172_v18, %v1739_v9  ;;  %v180_v20 = vrot.slane %v168_v17, %v171_v12  ;;  %v174_v21 = vmul.f32 %v1735_v7, %v172_v18  ;;  %v175_v22 = vmul.f32 %v172_v18, %v1749_v15 }
 0x1f3   :  { %v176_v23 = vmul.f32 %v1745_v13, %v172_v18 }
 0x1f4   :  { %v1809_v24 = vadd.f32 %v180_v20, %v173_v19  ;;  %v1811_v25 = vadd.f32 %v180_v20, %v174_v21  ;;  %v1813_v26 = vadd.f32 %v180_v20, %v175_v22 }
 0x1f5   :  { %v1815_v27 = vadd.f32 %v180_v20, %v176_v23 }
 0x1f6   :  { %v185_v28 = vand.u32 2147483647, %v1809_v24  ;;  %v186_v29 = vand.u32 2147483647, %v1811_v25  ;;  %v187_v9 = vand.u32 2147483647, %v1813_v26 }
 0x1f7   :  { %v188_v7 = vand.u32 2147483647, %v1815_v27 }
 0x1f8   :  { %v189_v15 = vmul.f32 0.70710677, %v185_v28  ;;  %v190_v13 = vmul.f32 0.70710677, %v186_v29  ;;  %v191_v30 = vmul.f32 0.70710677, %v187_v9 }
 0x1f9   :  { %v192_v31 = vmul.f32 0.70710677, %v188_v7 }
 0x1fa   :  { %v193_v32 = vmul.f32 0.3275911, %v189_v15  ;;  %v194_v33 = vmul.f32 0.3275911, %v190_v13  ;;  %v195_v34 = vmul.f32 0.3275911, %v191_v30 }
 0x1fb   :  { %v196_v37 = vmul.f32 0.3275911, %v192_v31  ;;  %v241_v40 = vsub.f32 0.0, %v189_v15  ;;  %v242_v41 = vsub.f32 0.0, %v190_v13  ;;  %v243_v44 = vsub.f32 0.0, %v191_v30 }
 0x1fc   :  { %v197_v35 = vadd.f32 1.0, %v193_v32  ;;  %v198_v36 = vadd.f32 1.0, %v194_v33  ;;  %v199_v38 = vadd.f32 1.0, %v195_v34  ;;  %v244_v49 = vsub.f32 0.0, %v192_v31 }
 0x1fd   :  { %v200_v39 = vadd.f32 1.0, %v196_v37  ;;  %v245_v43 = vmul.f32 %v241_v40, %v189_v15  ;;  %v246_v47 = vmul.f32 %v242_v41, %v190_v13  ;;  %v247_v54 = vmul.f32 %v243_v44, %v191_v30 }
 0x1fe   :  { %1632 = vrcp.f32 %v197_v35  ;;  %v248_v60 = vmul.f32 %v244_v49, %v192_v31 }
 0x1ff   :  { %1634 = vrcp.f32 %v198_v36  ;;  %v249_v52 = vmul.f32 1.442695, %v245_v43  ;;  %v251_v56 = vmul.f32 1.442695, %v246_v47  ;;  %v253_v1 = vmul.f32 1.442695, %v247_v54 }
 0x200   :  { %1636 = vrcp.f32 %v199_v38  ;;  %v255_v6 = vmul.f32 1.442695, %v248_v60 }
 0x201   :  { %1638 = vrcp.f32 %v200_v39 }
 0x202   :  { %1640 = vpow2.f32 %v249_v52 }
 0x203   :  { %1642 = vpow2.f32 %v251_v56 }
 0x204   :  { %1644 = vpow2.f32 %v253_v1 }
 0x205   :  { %1646 = vpow2.f32 %v255_v6 }
 0x208   :  { %v1633_v42 = vpop.eup %1632 }
 0x209   :  { %v1635_v45 = vpop.eup %1634  ;;  %v205_v46 = vmul.f32 1.0614054, %v1633_v42 }
 0x20a   :  { %v206_v48 = vmul.f32 1.0614054, %v1635_v45  ;;  %v1637_v51 = vpop.eup %1636 }
 0x20b   :  { %v209_v50 = vadd.f32 -1.4531521, %v205_v46  ;;  %v207_v57 = vmul.f32 1.0614054, %v1637_v51  ;;  %v1639_v58 = vpop.eup %1638 }
 0x20c   :  { %v210_v53 = vadd.f32 -1.4531521, %v206_v48  ;;  %v208_v63 = vmul.f32 1.0614054, %v1639_v58  ;;  %v1641_v30 = vpop.eup %1640 }
 0x20d   :  { %v213_v55 = vmul.f32 %v1633_v42, %v209_v50  ;;  %v211_v62 = vadd.f32 -1.4531521, %v207_v57  ;;  %v1643_v32 = vpop.eup %1642 }
 0x20e   :  { %v214_v59 = vmul.f32 %v1635_v45, %v210_v53  ;;  %v212_v4 = vadd.f32 -1.4531521, %v208_v63  ;;  %v1645_v40 = vpop.eup %1644 }
 0x20f   :  { %v217_v61 = vadd.f32 1.4214138, %v213_v55  ;;  %v215_v3 = vmul.f32 %v1637_v51, %v211_v62 }
 0x210   :  { %v218_v0 = vadd.f32 1.4214138, %v214_v59  ;;  %v216_v11 = vmul.f32 %v1639_v58, %v212_v4 }
 0x211   :  { %v221_v2 = vmul.f32 %v1633_v42, %v217_v61  ;;  %v219_v10 = vadd.f32 1.4214138, %v215_v3 }
 0x212   :  { %v222_v5 = vmul.f32 %v1635_v45, %v218_v0  ;;  %v220_v17 = vadd.f32 1.4214138, %v216_v11 }
 0x213   :  { %v225_v8 = vadd.f32 -0.28449672, %v221_v2  ;;  %v223_v16 = vmul.f32 %v1637_v51, %v219_v10 }
 0x214   :  { %v226_v12 = vadd.f32 -0.28449672, %v222_v5  ;;  %v224_v21 = vmul.f32 %v1639_v58, %v220_v17 }
 0x215   :  { %v229_v14 = vmul.f32 %v1633_v42, %v225_v8  ;;  %v227_v20 = vadd.f32 -0.28449672, %v223_v16 }
 0x216   :  { %v230_v18 = vmul.f32 %v1635_v45, %v226_v12  ;;  %v228_v13 = vadd.f32 -0.28449672, %v224_v21 }
 0x217   :  { %v233_v19 = vadd.f32 0.2548296, %v229_v14  ;;  %v231_v15 = vmul.f32 %v1637_v51, %v227_v20 }
 0x218   :  { %v234_v22 = vadd.f32 0.2548296, %v230_v18  ;;  %v232_v35 = vmul.f32 %v1639_v58, %v228_v13 }
 0x219   :  { %v237_v23 = vmul.f32 %v1633_v42, %v233_v19  ;;  %v235_v34 = vadd.f32 0.2548296, %v231_v15  ;;  %v1647_v42 = vpop.eup %1646 }
 0x21a   :  { %v238_v31 = vmul.f32 %v1635_v45, %v234_v22  ;;  %v236_v39 = vadd.f32 0.2548296, %v232_v35 }
 0x21b   :  { %v257_v33 = vmul.f32 %v1641_v30, %v237_v23  ;;  %v239_v38 = vmul.f32 %v1637_v51, %v235_v34 }
 0x21c   :  { %v258_v36 = vmul.f32 %v1643_v32, %v238_v31  ;;  %v240_v46 = vmul.f32 %v1639_v58, %v236_v39 }
 0x21d   :  { %v261_v37 = vsub.f32 1.0, %v257_v33  ;;  %v259_v44 = vmul.f32 %v1645_v40, %v239_v38 }
 0x21e   :  { %v262_v41 = vsub.f32 1.0, %v258_v36  ;;  %v260_v49 = vmul.f32 %v1647_v42, %v240_v46 }
 0x21f   :  { %v265_v43 = vmul.f32 %v261_v37, %v185_v28  ;;  %v263_v48 = vsub.f32 1.0, %v259_v44 }
 0x220   :  { %v266_v47 = vmul.f32 %v262_v41, %v186_v29  ;;  %v264_v53 = vsub.f32 1.0, %v260_v49 }
 0x221   :  { %v269_v45 = vadd.f32 %v265_v43, %v1809_v24  ;;  %v267_v51 = vmul.f32 %v263_v48, %v187_v9 }
 0x222   :  { %v270_v50 = vadd.f32 %v266_v47, %v1811_v25  ;;  %v268_v55 = vmul.f32 %v264_v53, %v188_v7  ;;  %v518_v25 = vld [vmem:[%s2041_s4] sm:$0xff] }
 0x223   :  { %v273_v52 = vmul.f32 0.5, %v269_v45  ;;  %v271_v28 = vadd.f32 %v267_v51, %v1813_v26  ;;  %1453 = vmatprep.mubr.msk.f32.mxu0 %vm522_vm2, %v518_v25  ;;  %v1306_v26 = vld [vmem:[%s2041_s4 + $0x40] sm:$0xff] }
 0x224   :  { %v274_v54 = vmul.f32 0.5, %v270_v50  ;;  %v272_v24 = vadd.f32 %v268_v55, %v1815_v27 }
 0x225   :  { %1439 = vmatprep.mubr.f32.mxu1 %v273_v52  ;;  %v275_v29 = vmul.f32 0.5, %v271_v28 }
 0x226   :  { %1440 = vmatmul.mubr.f32.vlgmr.msra.gmra.mrb[0].mxu1 %v274_v54  ;;  %v276_v56 = vmul.f32 0.5, %v272_v24 }
 0x227   :  { %1442 = vmatprep.mubr.f32.mxu1 %v275_v29 }
 0x22a   :  { %1443 = vmatmul.mubr.f32.gmra.mrb[2].mxu1 %v276_v56 }
 0x22b   :  { %1509 = vmatprep.mubr.msk.f32.mxu1 %vm522_vm2, %v1306_v26 }
 0x2f9   :  { %v1441_v9 = vpop.f32.mrb[0].mxu1 }
 0x2fa   :  { %v380_v27 = vsel %vm378_vm3, %v1441_v9, 0.0  ;;  %v394_v7 = vmul.f32 %v1441_v9, %v1441_v9  ;;  %v359_v57 = vpop.f32.mrb[1].mxu1 }
 0x2fb   :  { %v379_v58 = vsel %vm378_vm3, %v359_v57, 0.0  ;;  %v393_v59 = vmul.f32 %v359_v57, %v359_v57 }
 0x2fc   :  { %v398_v60 = vsel %vm378_vm3, %v394_v7, 0.0  ;;  %v381_v61 = vadd.f32 %v380_v27, %v379_v58 }
 0x2fd   :  { %v397_v62 = vsel %vm378_vm3, %v393_v59, 0.0  ;;  %v1444_v0 = vpop.f32.mrb[2].mxu1 }
 0x2fe   :  { %v399_v63 = vadd.f32 %v398_v60, %v397_v62  ;;  %v369_v1 = vpop.f32.mrb[3].mxu1  ;;  %v396_v2 = vmul.f32 %v1444_v0, %v1444_v0  ;;  %v385_v6 = vsel %vm384_vm4, %v1444_v0, 0.0 }
 0x2ff   :  { %v382_v3 = vsel %vm378_vm3, %v369_v1, 0.0  ;;  %v395_v4 = vmul.f32 %v369_v1, %v369_v1 }
 0x300   :  { %v383_v5 = vadd.f32 %v382_v3, %v381_v61  ;;  %v402_v12 = vsel %vm384_vm4, %v396_v2, 0.0 }
 0x301   :  { %v400_v8 = vsel %vm378_vm3, %v395_v4, 0.0 }
 0x302   :  { %v386_v10 = vadd.f32 %v385_v6, %v383_v5  ;;  %v401_v11 = vadd.f32 %v400_v8, %v399_v63 }
 0x304   :  { %v387_v14 = vrot.slane %v386_v10, 4  ;;  %v403_v16 = vadd.f32 %v402_v12, %v401_v11 }
 0x306   :  { %v388_v17 = vadd.f32 %v387_v14, %v386_v10  ;;  %v404_v18 = vrot.slane %v403_v16, 4 }
 0x308   :  { %v389_v19 = vrot.slane %v388_v17, 2  ;;  %v405_v20 = vadd.f32 %v404_v18, %v403_v16 }
 0x30a   :  { %v390_v21 = vadd.f32 %v389_v19, %v388_v17  ;;  %v406_v22 = vrot.slane %v405_v20, 2 }
 0x30c   :  { %v391_v23 = vrot.slane %v390_v21, 1  ;;  %v407_v15 = vadd.f32 %v406_v22, %v405_v20 }
 0x30e   :  { %v392_v13 = vadd.f32 %v391_v23, %v390_v21  ;;  %v408_v30 = vrot.slane %v407_v15, 1 }
 0x310   :  { %v409_v31 = vadd.f32 %v408_v30, %v407_v15  ;;  %v410_v32 = vmul.f32 0.03846154, %v392_v13 }
 0x312   :  { %v411_v33 = vmul.f32 0.03846154, %v409_v31  ;;  %v412_v34 = vmul.f32 %v410_v32, %v410_v32  ;;  %v416_v37 = vsub.f32 0.0, %v410_v32 }
 0x314   :  { %v413_v35 = vsub.f32 %v411_v33, %v412_v34 }
 0x316   :  { %v414_v36 = vadd.f32 1e-05, %v413_v35 }
 0x318   :  { %1648 = vrsqrt.f32 %v414_v36 }
 0x322   :  { %v1649_v38 = vpop.eup %1648 }
 0x323   :  { %v417_v39 = vmul.f32 %v1649_v38, %v416_v37  ;;  %v418_v40 = vmul.f32 %v1649_v38, %v359_v57  ;;  %v419_v41 = vmul.f32 %v1649_v38, %v1441_v9  ;;  %v420_v43 = vmul.f32 %v1649_v38, %v369_v1 }
 0x324   :  { %v421_v44 = vmul.f32 %v1649_v38, %v1444_v0 }
 0x325   :  { %v1855_v46 = vadd.f32 %v418_v40, %v417_v39  ;;  %v1857_v42 = vadd.f32 %v419_v41, %v417_v39  ;;  %v1859_v47 = vadd.f32 %v420_v43, %v417_v39 }
 0x326   :  { %v1861_v45 = vadd.f32 %v421_v44, %v417_v39 }
 0x327   :  { %v426_v48 = vand.u32 2147483647, %v1855_v46  ;;  %v427_v49 = vand.u32 2147483647, %v1857_v42  ;;  %v428_v50 = vand.u32 2147483647, %v1859_v47 }
 0x328   :  { %v429_v52 = vand.u32 2147483647, %v1861_v45 }
 0x329   :  { %v430_v51 = vmul.f32 0.70710677, %v426_v48  ;;  %v431_v53 = vmul.f32 0.70710677, %v427_v49  ;;  %v432_v54 = vmul.f32 0.70710677, %v428_v50 }
 0x32a   :  { %v433_v28 = vmul.f32 0.70710677, %v429_v52 }
 0x32b   :  { %v434_v55 = vmul.f32 0.3275911, %v430_v51  ;;  %v435_v29 = vmul.f32 0.3275911, %v431_v53  ;;  %v436_v24 = vmul.f32 0.3275911, %v432_v54 }
 0x32c   :  { %v437_v56 = vmul.f32 0.3275911, %v433_v28  ;;  %v482_v7 = vsub.f32 0.0, %v430_v51  ;;  %v483_v57 = vsub.f32 0.0, %v431_v53  ;;  %v484_v58 = vsub.f32 0.0, %v432_v54 }
 0x32d   :  { %v438_v25 = vadd.f32 1.0, %v434_v55  ;;  %v439_v26 = vadd.f32 1.0, %v435_v29  ;;  %v440_v9 = vadd.f32 1.0, %v436_v24  ;;  %v485_v59 = vsub.f32 0.0, %v433_v28 }
 0x32e   :  { %v441_v27 = vadd.f32 1.0, %v437_v56  ;;  %v486_v61 = vmul.f32 %v482_v7, %v430_v51  ;;  %v487_v63 = vmul.f32 %v483_v57, %v431_v53  ;;  %v488_v2 = vmul.f32 %v484_v58, %v432_v54 }
 0x32f   :  { %1650 = vrcp.f32 %v438_v25  ;;  %v489_v6 = vmul.f32 %v485_v59, %v433_v28 }
 0x330   :  { %1652 = vrcp.f32 %v439_v26  ;;  %v490_v11 = vmul.f32 1.442695, %v486_v61  ;;  %v492_v16 = vmul.f32 1.442695, %v487_v63  ;;  %v494_v19 = vmul.f32 1.442695, %v488_v2 }
 0x331   :  { %1654 = vrcp.f32 %v440_v9  ;;  %v496_v22 = vmul.f32 1.442695, %v489_v6 }
 0x332   :  { %1656 = vrcp.f32 %v441_v27 }
 0x333   :  { %1658 = vpow2.f32 %v490_v11 }
 0x334   :  { %1660 = vpow2.f32 %v492_v16  ;;  %v1309_v16 = vld [vmem:[%s2041_s4 + $0x58] sm:$0x3] }
 0x335   :  { %1662 = vpow2.f32 %v494_v19  ;;  %v1287_v19 = vld [vmem:[%s2041_s4 + $0x30] sm:$0xff] }
 0x336   :  { %1664 = vpow2.f32 %v496_v22  ;;  %v1295_v22 = vld [vmem:[%s2042_s3 + $0x28] sm:$0xff] }
 0x339   :  { %v1651_v60 = vpop.eup %1650 }
 0x33a   :  { %v1653_v62 = vpop.eup %1652  ;;  %v446_v0 = vmul.f32 1.0614054, %v1651_v60 }
 0x33b   :  { %v1655_v1 = vpop.eup %1654  ;;  %v447_v3 = vmul.f32 1.0614054, %v1653_v62 }
 0x33c   :  { %v1657_v4 = vpop.eup %1656  ;;  %v448_v5 = vmul.f32 1.0614054, %v1655_v1  ;;  %v450_v8 = vadd.f32 -1.4531521, %v446_v0 }
 0x33d   :  { %v449_v10 = vmul.f32 1.0614054, %v1657_v4  ;;  %v451_v12 = vadd.f32 -1.4531521, %v447_v3  ;;  %v1659_v55 = vpop.eup %1658 }
 0x33e   :  { %v452_v14 = vadd.f32 -1.4531521, %v448_v5  ;;  %v454_v17 = vmul.f32 %v1651_v60, %v450_v8  ;;  %v1661_v56 = vpop.eup %1660 }
 0x33f   :  { %v453_v18 = vadd.f32 -1.4531521, %v449_v10  ;;  %v455_v20 = vmul.f32 %v1653_v62, %v451_v12  ;;  %v1663_v9 = vpop.eup %1662 }
 0x340   :  { %v456_v21 = vmul.f32 %v1655_v1, %v452_v14  ;;  %v458_v23 = vadd.f32 1.4214138, %v454_v17  ;;  %v1665_v57 = vpop.eup %1664  ;;  %v1285_v17 = vld [vmem:[%s2041_s4 + $0x20] sm:$0xff] }
 0x341   :  { %v457_v15 = vmul.f32 %v1657_v4, %v453_v18  ;;  %v459_v13 = vadd.f32 1.4214138, %v455_v20  ;;  %v1286_v18 = vld [vmem:[%s2041_s4 + $0x28] sm:$0xff]  ;;  %v1288_v20 = vld [vmem:[%s2041_s4 + $0x38] sm:$0x3] }
 0x342   :  { %v460_v30 = vadd.f32 1.4214138, %v456_v21  ;;  %v462_v31 = vmul.f32 %v1651_v60, %v458_v23  ;;  %v1294_v21 = vld [vmem:[%s2042_s3 + $0x20] sm:$0xff] }
 0x343   :  { %v461_v32 = vadd.f32 1.4214138, %v457_v15  ;;  %v463_v33 = vmul.f32 %v1653_v62, %v459_v13  ;;  %v1585_v23 = vpack.c.bf16 %v1295_v22, %v1294_v21  ;;  %v1296_v15 = vld [vmem:[%s2042_s3 + $0x30] sm:$0xff]  ;;  %v1297_v13 = vld [vmem:[%s2042_s3 + $0x38] sm:$0xff] }
 0x344   :  { %v464_v34 = vmul.f32 %v1655_v1, %v460_v30  ;;  %v466_v35 = vadd.f32 -0.28449672, %v462_v31  ;;  %v1589_v30 = vpack.c.bf16 %v1297_v13, %v1296_v15  ;;  %v623_v31 = vld [vmem:[%s2042_s3] sm:$0xff] }
 0x345   :  { %v465_v36 = vmul.f32 %v1657_v4, %v461_v32  ;;  %v467_v37 = vadd.f32 -0.28449672, %v463_v33  ;;  %v624_v32 = vld [vmem:[%s2042_s3 + $0x8] sm:$0xff] }
 0x346   :  { %v468_v38 = vadd.f32 -0.28449672, %v464_v34  ;;  %v470_v39 = vmul.f32 %v1651_v60, %v466_v35  ;;  %v1593_v33 = vpack.c.bf16 %v624_v32, %v623_v31 }
 0x347   :  { %v469_v40 = vadd.f32 -0.28449672, %v465_v36  ;;  %v471_v41 = vmul.f32 %v1653_v62, %v467_v37 }
 0x348   :  { %v472_v43 = vmul.f32 %v1655_v1, %v468_v38  ;;  %v474_v44 = vadd.f32 0.2548296, %v470_v39 }
 0x349   :  { %v473_v51 = vmul.f32 %v1657_v4, %v469_v40  ;;  %v475_v53 = vadd.f32 0.2548296, %v471_v41 }
 0x34a   :  { %v476_v54 = vadd.f32 0.2548296, %v472_v43  ;;  %v478_v28 = vmul.f32 %v1651_v60, %v474_v44  ;;  %v625_v43 = vld [vmem:[%s2042_s3 + $0x10] sm:$0xff]  ;;  %v626_v44 = vld [vmem:[%s2042_s3 + $0x18] sm:$0xff] }
 0x34b   :  { %v477_v29 = vadd.f32 0.2548296, %v473_v51  ;;  %v479_v24 = vmul.f32 %v1653_v62, %v475_v53 }
 0x34c   :  { %v480_v25 = vmul.f32 %v1655_v1, %v476_v54  ;;  %v498_v26 = vmul.f32 %v1659_v55, %v478_v28  ;;  %v1597_v54 = vpack.c.bf16 %v626_v44, %v625_v43  ;;  %v1315_v28 = vld [vmem:[%s2042_s3 + $0x40] sm:$0xff]  ;;  %v1316_v55 = vld [vmem:[%s2042_s3 + $0x48] sm:$0xff] }
 0x34d   :  { %v481_v27 = vmul.f32 %v1657_v4, %v477_v29  ;;  %v499_v7 = vmul.f32 %v1661_v56, %v479_v24  ;;  %v1611_v56 = vpack.c.bf16 %v1316_v55, %v1315_v28 }
 0x34e   :  { %v500_v58 = vmul.f32 %v1663_v9, %v480_v25  ;;  %v502_v59 = vsub.f32 1.0, %v498_v26  ;;  %v1317_v25 = vld [vmem:[%s2042_s3 + $0x50] sm:$0xff]  ;;  %v1318_v26 = vld [vmem:[%s2042_s3 + $0x58] sm:$0xff] }
 0x34f   :  { %v501_v61 = vmul.f32 %v1665_v57, %v481_v27  ;;  %v503_v63 = vsub.f32 1.0, %v499_v7  ;;  %v1615_v9 = vpack.c.bf16 %v1318_v26, %v1317_v25 }
 0x350   :  { %v504_v0 = vsub.f32 1.0, %v500_v58  ;;  %v506_v2 = vmul.f32 %v502_v59, %v426_v48 }
 0x351   :  { %v505_v3 = vsub.f32 1.0, %v501_v61  ;;  %v507_v60 = vmul.f32 %v503_v63, %v427_v49 }
 0x352   :  { %v508_v62 = vmul.f32 %v504_v0, %v428_v50  ;;  %v510_v1 = vadd.f32 %v506_v2, %v1855_v46  ;;  %v1308_v50 = vld [vmem:[%s2041_s4 + $0x50] sm:$0xff] }
 0x353   :  { %v509_v4 = vmul.f32 %v505_v3, %v429_v52  ;;  %v511_v5 = vadd.f32 %v507_v60, %v1857_v42  ;;  %v519_v42 = vld [vmem:[%s2041_s4 + $0x8] sm:$0xff]  ;;  %v521_v52 = vld [vmem:[%s2041_s4 + $0x18] sm:$0x3] }
 0x354   :  { %v512_v6 = vadd.f32 %v508_v62, %v1859_v47  ;;  %v514_v8 = vmul.f32 0.5, %v510_v1  ;;  %v1307_v47 = vld [vmem:[%s2041_s4 + $0x48] sm:$0xff] }
 0x355   :  { %v513_v10 = vadd.f32 %v509_v4, %v1861_v45  ;;  %v515_v48 = vmul.f32 0.5, %v511_v5  ;;  %v520_v45 = vld [vmem:[%s2041_s4 + $0x10] sm:$0xff] }
 0x356   :  { %v516_v11 = vmul.f32 0.5, %v512_v6 }
 0x357   :  { %v517_v12 = vmul.f32 0.5, %v513_v10  ;;  %v1565_v14 = vpack.c.bf16 %v515_v48, %v514_v8 }
 0x359   :  { %v1569_v46 = vpack.c.bf16 %v517_v12, %v516_v11  ;;  %1566 = vmatprep.subr.bf16.mxu0 %v1565_v14  ;;  %1602 = vmatprep.subr.bf16.mxu1 %v1565_v14 }
 0x35a   :  { %1568 = vmatpush3.bf16.msra.mxu0 %v1565_v14  ;;  %1604 = vmatpush3.bf16.msra.mxu1 %v1565_v14 }
 0x35b   :  { %1571 = vmatprep.subr.msk.bf16.mxu0 %vm1888_vm6, %v1569_v46  ;;  %1607 = vmatprep.subr.msk.bf16.mxu1 %vm1888_vm6, %v1569_v46 }
 0x35e   :  { %1574 = vmatpush3.bf16.msk.msra.mxu0 %vm1888_vm6, %v1569_v46  ;;  %1610 = vmatpush3.bf16.msk.msra.mxu1 %vm1888_vm6, %v1569_v46 }
 0x35f   :  { %1576 = vmatprep.subr.bf16.mxu0 %v1565_v14 }
 0x361   :  { %1454 = vmatmul.mubr.msk.f32.vlgmr.msra.gmra.mrb[4].mxu0 %vm522_vm2, %v519_v42  ;;  %1510 = vmatmul.mubr.msk.f32.vlgmr.msra.gmra.mrb[4].mxu1 %vm522_vm2, %v1307_v47 }
 0x362   :  { %1578 = vmatpush3.bf16.msra.mxu0 %v1565_v14  ;;  %1456 = vmatprep.mubr.msk.f32.mxu0 %vm522_vm2, %v520_v45 }
 0x363   :  { %1581 = vmatprep.subr.msk.bf16.mxu0 %vm1888_vm6, %v1569_v46  ;;  %1512 = vmatprep.mubr.msk.f32.mxu1 %vm522_vm2, %v1308_v50 }
 0x365   :  { %1457 = vmatmul.mubr.msk.f32.gmra.mrb[6].mxu0 %vm522_vm2, %v521_v52  ;;  %1513 = vmatmul.mubr.msk.f32.gmra.mrb[6].mxu1 %vm522_vm2, %v1309_v16 }
 0x366   :  { %1584 = vmatpush3.bf16.msk.msra.mxu0 %vm1888_vm6, %v1569_v46  ;;  %1467 = vmatprep.mubr.msk.f32.mxu0 %vm522_vm2, %v1285_v17 }
 0x367   :  { %1586 = vmatprep.subr.bf16.mxu0 %v1585_v23 }
 0x369   :  { %1468 = vmatmul.mubr.msk.f32.vlgmr.msra.gmra.mrb[8].mxu0 %vm522_vm2, %v1286_v18 }
 0x36a   :  { %1470 = vmatprep.mubr.msk.f32.mxu0 %vm522_vm2, %v1287_v19  ;;  %1588 = vmatpush3.bf16.msra.mxu0 %v1585_v23 }
 0x36b   :  { %1590 = vmatprep.subr.bf16.mxu0 %v1589_v30 }
 0x36d   :  { %1471 = vmatmul.mubr.msk.f32.gmra.mrb[10].mxu0 %vm522_vm2, %v1288_v20 }
 0x36e   :  { %1592 = vmatpush3.bf16.msra.mxu0 %v1589_v30 }
 0x36f   :  { %1594 = vmatprep.subr.bf16.mxu0 %v1593_v33 }
 0x434   :  { %v1455_v34 = vpop.f32.mrb[4].mxu0  ;;  %v1511_v35 = vpop.f32.mrb[4].mxu1 }
 0x435   :  { %v604_v36 = vpop.f32.mrb[5].mxu0  ;;  %v1011_v37 = vpop.f32.mrb[5].mxu1 }
 0x438   :  { %v1458_v38 = vpop.f32.mrb[6].mxu0  ;;  %v1514_v39 = vpop.f32.mrb[6].mxu1 }
 0x439   :  { %v614_v40 = vpop.f32.mrb[7].mxu0  ;;  %v1021_v41 = vpop.f32.mrb[7].mxu1 }
 0x43c   :  { %v1469_v51 = vpop.f32.mrb[8].mxu0 }
 0x43d   :  { %v710_v53 = vpop.f32.mrb[9].mxu0 }
 0x43e   :  { %1481 = vmatprep.mubr.msk.f32.mxu0 %vm378_vm3, %v710_v53 }
 0x43f   :  { %1482 = vmatmul.mubr.msk.f32.vlgmr.msra.gmra.mrb[12].mxu0 %vm378_vm3, %v1469_v51 }
 0x440   :  { %v1472_v29 = vpop.f32.mrb[10].mxu0  ;;  %1596 = vmatpush3.bf16.msra.mxu0 %v1593_v33 }
 0x441   :  { %v720_v24 = vpop.f32.mrb[11].mxu0  ;;  %1598 = vmatprep.subr.bf16.mxu0 %v1597_v54 }
 0x442   :  { %1484 = vmatprep.mubr.msk.f32.mxu0 %vm378_vm3, %v720_v24 }
 0x443   :  { %1485 = vmatmul.mubr.msk.f32.gmra.mrb[14].mxu0 %vm378_vm3, %v1472_v29 }
 0x444   :  { %1600 = vmatpush3.bf16.msra.mxu0 %v1597_v54  ;;  %1495 = vmatprep.mubr.msk.f32.mxu0 %vm378_vm3, %v604_v36 }
 0x445   :  { %1612 = vmatprep.subr.bf16.mxu0 %v1611_v56 }
 0x447   :  { %1496 = vmatmul.mubr.msk.f32.vlgmr.msra.gmra.mrb[12].mxu0 %vm378_vm3, %v1455_v34 }
 0x448   :  { %1498 = vmatprep.mubr.msk.f32.mxu0 %vm378_vm3, %v614_v40  ;;  %1614 = vmatpush3.bf16.msra.mxu0 %v1611_v56 }
 0x449   :  { %1616 = vmatprep.subr.bf16.mxu0 %v1615_v9 }
 0x44b   :  { %1499 = vmatmul.mubr.msk.f32.gmra.mrb[14].mxu0 %vm378_vm3, %v1458_v38 }
 0x44c   :  { %1618 = vmatpush3.bf16.msra.mxu0 %v1615_v9  ;;  %1523 = vmatprep.mubr.msk.f32.mxu0 %vm378_vm3, %v1011_v37 }
 0x44f   :  { %1524 = vmatmul.mubr.msk.f32.vlgmr.msra.gmra.mrb[12].mxu0 %vm378_vm3, %v1511_v35 }
 0x450   :  { %1526 = vmatprep.mubr.msk.f32.mxu0 %vm378_vm3, %v1021_v41 }
 0x453   :  { %1527 = vmatmul.mubr.msk.f32.gmra.mrb[14].mxu0 %vm378_vm3, %v1514_v39 }
 0x522   :  { %v1525_v27 = vpop.f32.mrb[12].mxu0 }
 0x523   :  { %v1147_v7 = vmul.f32 %v1525_v27, %v1525_v27  ;;  %v1113_v57 = vpop.f32.mrb[13].mxu0 }
 0x524   :  { %v1136_v58 = vadd.f32 %v1525_v27, %v1113_v57  ;;  %v1146_v59 = vmul.f32 %v1113_v57, %v1113_v57 }
 0x526   :  { %v1150_v61 = vadd.f32 %v1147_v7, %v1146_v59  ;;  %v1528_v63 = vpop.f32.mrb[14].mxu0 }
 0x527   :  { %v1149_v0 = vmul.f32 %v1528_v63, %v1528_v63  ;;  %v1123_v2 = vpop.f32.mrb[15].mxu0  ;;  %v1138_v62 = vsel %vm126_vm1, %v1528_v63, 0.0 }
 0x528   :  { %v1137_v3 = vadd.f32 %v1136_v58, %v1123_v2  ;;  %v1148_v60 = vmul.f32 %v1123_v2, %v1123_v2 }
 0x529   :  { %v1152_v5 = vsel %vm126_vm1, %v1149_v0, 0.0 }
 0x52a   :  { %v1139_v1 = vadd.f32 %v1138_v62, %v1137_v3  ;;  %v1151_v4 = vadd.f32 %v1150_v61, %v1148_v60 }
 0x52c   :  { %v1140_v6 = vrot.slane %v1139_v1, 4  ;;  %v1153_v8 = vadd.f32 %v1152_v5, %v1151_v4 }
 0x52e   :  { %v1141_v10 = vadd.f32 %v1140_v6, %v1139_v1  ;;  %v1154_v48 = vrot.slane %v1153_v8, 4 }
 0x530   :  { %v1142_v11 = vrot.slane %v1141_v10, 2  ;;  %v1155_v12 = vadd.f32 %v1154_v48, %v1153_v8 }
 0x532   :  { %v1143_v14 = vadd.f32 %v1142_v11, %v1141_v10  ;;  %v1156_v49 = vrot.slane %v1155_v12, 2 }
 0x534   :  { %v1144_v46 = vrot.slane %v1143_v14, 1  ;;  %v1157_v42 = vadd.f32 %v1156_v49, %v1155_v12 }
 0x536   :  { %v1145_v47 = vadd.f32 %v1144_v46, %v1143_v14  ;;  %v1158_v45 = vrot.slane %v1157_v42, 1 }
 0x538   :  { %v1159_v50 = vadd.f32 %v1158_v45, %v1157_v42  ;;  %v1160_v52 = vmul.f32 0.045454547, %v1145_v47 }
 0x53a   :  { %v1161_v16 = vmul.f32 0.045454547, %v1159_v50  ;;  %v1162_v17 = vmul.f32 %v1160_v52, %v1160_v52  ;;  %v1166_v20 = vsub.f32 0.0, %v1160_v52 }
 0x53c   :  { %v1163_v18 = vsub.f32 %v1161_v16, %v1162_v17 }
 0x53e   :  { %v1164_v19 = vadd.f32 1e-05, %v1163_v18 }
 0x540   :  { %1666 = vrsqrt.f32 %v1164_v19 }
 0x54a   :  { %v1667_v21 = vpop.eup %1666 }
 0x54b   :  { %v1167_v22 = vmul.f32 %v1667_v21, %v1166_v20  ;;  %v1168_v23 = vmul.f32 %v1667_v21, %v1113_v57  ;;  %v1169_v15 = vmul.f32 %v1667_v21, %v1525_v27  ;;  %v1170_v13 = vmul.f32 %v1667_v21, %v1123_v2 }
 0x54c   :  { %v1171_v30 = vmul.f32 %v1667_v21, %v1528_v63 }
 0x54d   :  { %v1994_v31 = vadd.f32 %v1168_v23, %v1167_v22  ;;  %v1996_v32 = vadd.f32 %v1169_v15, %v1167_v22  ;;  %v1998_v33 = vadd.f32 %v1170_v13, %v1167_v22 }
 0x54e   :  { %v2000_v34 = vadd.f32 %v1171_v30, %v1167_v22 }
 0x54f   :  { %v1176_v35 = vand.u32 2147483647, %v1994_v31  ;;  %v1177_v36 = vand.u32 2147483647, %v1996_v32  ;;  %v1178_v37 = vand.u32 2147483647, %v1998_v33 }
 0x550   :  { %v1179_v38 = vand.u32 2147483647, %v2000_v34 }
 0x551   :  { %v1180_v39 = vmul.f32 0.70710677, %v1176_v35  ;;  %v1181_v40 = vmul.f32 0.70710677, %v1177_v36  ;;  %v1182_v41 = vmul.f32 0.70710677, %v1178_v37 }
 0x552   :  { %v1183_v43 = vmul.f32 0.70710677, %v1179_v38 }
 0x553   :  { %v1184_v44 = vmul.f32 0.3275911, %v1180_v39  ;;  %v1185_v51 = vmul.f32 0.3275911, %v1181_v40  ;;  %v1186_v53 = vmul.f32 0.3275911, %v1182_v41 }
 0x554   :  { %v1187_v54 = vmul.f32 0.3275911, %v1183_v43  ;;  %v1232_v56 = vsub.f32 0.0, %v1180_v39  ;;  %v1233_v25 = vsub.f32 0.0, %v1181_v40  ;;  %v1234_v26 = vsub.f32 0.0, %v1182_v41 }
 0x555   :  { %v1188_v28 = vadd.f32 1.0, %v1184_v44  ;;  %v1189_v55 = vadd.f32 1.0, %v1185_v51  ;;  %v1190_v29 = vadd.f32 1.0, %v1186_v53  ;;  %v1235_v9 = vsub.f32 0.0, %v1183_v43 }
 0x556   :  { %v1191_v24 = vadd.f32 1.0, %v1187_v54  ;;  %v1236_v7 = vmul.f32 %v1232_v56, %v1180_v39  ;;  %v1237_v59 = vmul.f32 %v1233_v25, %v1181_v40  ;;  %v1238_v0 = vmul.f32 %v1234_v26, %v1182_v41 }
 0x557   :  { %1668 = vrcp.f32 %v1188_v28  ;;  %v1239_v62 = vmul.f32 %v1235_v9, %v1183_v43 }
 0x558   :  { %1670 = vrcp.f32 %v1189_v55  ;;  %v1240_v5 = vmul.f32 1.442695, %v1236_v7  ;;  %v1242_v10 = vmul.f32 1.442695, %v1237_v59  ;;  %v1244_v12 = vmul.f32 1.442695, %v1238_v0 }
 0x559   :  { %1672 = vrcp.f32 %v1190_v29  ;;  %v1246_v46 = vmul.f32 1.442695, %v1239_v62 }
 0x55a   :  { %1674 = vrcp.f32 %v1191_v24 }
 0x55b   :  { %1676 = vpow2.f32 %v1240_v5 }
 0x55c   :  { %1678 = vpow2.f32 %v1242_v10 }
 0x55d   :  { %1680 = vpow2.f32 %v1244_v12 }
 0x55e   :  { %1682 = vpow2.f32 %v1246_v46 }
 0x561   :  { %v1669_v27 = vpop.eup %1668 }
 0x562   :  { %v1671_v57 = vpop.eup %1670  ;;  %v1196_v58 = vmul.f32 1.0614054, %v1669_v27 }
 0x563   :  { %v1673_v61 = vpop.eup %1672  ;;  %v1197_v63 = vmul.f32 1.0614054, %v1671_v57 }
 0x564   :  { %v1675_v2 = vpop.eup %1674  ;;  %v1198_v3 = vmul.f32 1.0614054, %v1673_v61  ;;  %v1200_v60 = vadd.f32 -1.4531521, %v1196_v58 }
 0x565   :  { %v1199_v1 = vmul.f32 1.0614054, %v1675_v2  ;;  %v1201_v4 = vadd.f32 -1.4531521, %v1197_v63  ;;  %v1677_v44 = vpop.eup %1676 }
 0x566   :  { %v1202_v6 = vadd.f32 -1.4531521, %v1198_v3  ;;  %v1204_v8 = vmul.f32 %v1669_v27, %v1200_v60  ;;  %v1679_v54 = vpop.eup %1678 }
 0x567   :  { %v1203_v48 = vadd.f32 -1.4531521, %v1199_v1  ;;  %v1205_v11 = vmul.f32 %v1671_v57, %v1201_v4  ;;  %v1681_v29 = vpop.eup %1680 }
 0x568   :  { %v1206_v14 = vmul.f32 %v1673_v61, %v1202_v6  ;;  %v1208_v49 = vadd.f32 1.4214138, %v1204_v8  ;;  %v1683_v25 = vpop.eup %1682 }
 0x569   :  { %v1207_v42 = vmul.f32 %v1675_v2, %v1203_v48  ;;  %v1209_v47 = vadd.f32 1.4214138, %v1205_v11 }
 0x56a   :  { %v1210_v45 = vadd.f32 1.4214138, %v1206_v14  ;;  %v1212_v50 = vmul.f32 %v1669_v27, %v1208_v49 }
 0x56b   :  { %v1211_v52 = vadd.f32 1.4214138, %v1207_v42  ;;  %v1213_v16 = vmul.f32 %v1671_v57, %v1209_v47 }
 0x56c   :  { %v1214_v17 = vmul.f32 %v1673_v61, %v1210_v45  ;;  %v1216_v18 = vadd.f32 -0.28449672, %v1212_v50 }
 0x56d   :  { %v1215_v19 = vmul.f32 %v1675_v2, %v1211_v52  ;;  %v1217_v20 = vadd.f32 -0.28449672, %v1213_v16 }
 0x56e   :  { %v1218_v21 = vadd.f32 -0.28449672, %v1214_v17  ;;  %v1220_v22 = vmul.f32 %v1669_v27, %v1216_v18 }
 0x56f   :  { %v1219_v23 = vadd.f32 -0.28449672, %v1215_v19  ;;  %v1221_v15 = vmul.f32 %v1671_v57, %v1217_v20 }
 0x570   :  { %v1222_v13 = vmul.f32 %v1673_v61, %v1218_v21  ;;  %v1224_v30 = vadd.f32 0.2548296, %v1220_v22 }
 0x571   :  { %v1223_v39 = vmul.f32 %v1675_v2, %v1219_v23  ;;  %v1225_v40 = vadd.f32 0.2548296, %v1221_v15 }
 0x572   :  { %v1226_v41 = vadd.f32 0.2548296, %v1222_v13  ;;  %v1228_v43 = vmul.f32 %v1669_v27, %v1224_v30 }
 0x573   :  { %v1227_v51 = vadd.f32 0.2548296, %v1223_v39  ;;  %v1229_v53 = vmul.f32 %v1671_v57, %v1225_v40 }
 0x574   :  { %v1230_v28 = vmul.f32 %v1673_v61, %v1226_v41  ;;  %v1248_v55 = vmul.f32 %v1677_v44, %v1228_v43 }
 0x575   :  { %v1231_v24 = vmul.f32 %v1675_v2, %v1227_v51  ;;  %v1249_v56 = vmul.f32 %v1679_v54, %v1229_v53 }
 0x576   :  { %v1250_v26 = vmul.f32 %v1681_v29, %v1230_v28  ;;  %v1252_v9 = vsub.f32 1.0, %v1248_v55 }
 0x577   :  { %v1251_v7 = vmul.f32 %v1683_v25, %v1231_v24  ;;  %v1253_v58 = vsub.f32 1.0, %v1249_v56 }
 0x578   :  { %v1254_v59 = vsub.f32 1.0, %v1250_v26  ;;  %v1256_v63 = vmul.f32 %v1252_v9, %v1176_v35 }
 0x579   :  { %v1255_v0 = vsub.f32 1.0, %v1251_v7  ;;  %v1257_v27 = vmul.f32 %v1253_v58, %v1177_v36 }
 0x57a   :  { %v1258_v57 = vmul.f32 %v1254_v59, %v1178_v37  ;;  %v1260_v61 = vadd.f32 %v1256_v63, %v1994_v31 }
 0x57b   :  { %v1259_v2 = vmul.f32 %v1255_v0, %v1179_v38  ;;  %v1261_v3 = vadd.f32 %v1257_v27, %v1996_v32 }
 0x57c   :  { %v1262_v60 = vadd.f32 %v1258_v57, %v1998_v33  ;;  %v1264_v62 = vmul.f32 0.5, %v1260_v61 }
 0x57d   :  { %v1263_v1 = vadd.f32 %v1259_v2, %v2000_v34  ;;  %v1265_v35 = vmul.f32 0.5, %v1261_v3 }
 0x57e   :  { %v1266_v4 = vmul.f32 0.5, %v1262_v60  ;;  %1268 = vst [vmem:[%s2043_s5] sm:$0xff] %v1264_v62 }
 0x57f   :  { %v1267_v36 = vmul.f32 0.5, %v1263_v1  ;;  %1269 = vst [vmem:[%s2043_s5 + $0x8] sm:$0xff] %v1265_v35 }
 0x580   :  { %1270 = vst [vmem:[%s2043_s5 + $0x10] sm:$0xff] %v1266_v4 }
 0x581   :  { %1271 = vst [vmem:[%s2043_s5 + $0x18] sm:$0x3] %v1267_v36 }

</bundles_post_ra>
